<compile_context>
chip_gen: v5e
topology: v5e:2x2
jax: 0.10.0
libtpu: 0.0.40
codegen_flags: <defaults>
</compile_context>

<pallas_src>
import jax
import jax.numpy as jnp
from jax import lax
from jax.experimental import pallas as pl
from jax.experimental.pallas import tpu as pltpu

# Module hyper-parameters (fixed, deterministic configuration).
USER_NUM = 10
ITEM_NUM = 12
LATENT_DIM = 32
A_RANGE = 2.5        # a_range is not None    -> a = a_range * sigmoid(a)
THETA_RANGE = 3.0    # theta_range is not None -> theta = theta_range * sigmoid(theta)


def _mirt_lookup_kernel(user_ref, item_ref, m_ref, out_ref):
    """One batch tile: out[b] = sigmoid(M[user[b], item[b]]).

    user_ref, item_ref : [1, TB] int32   (batch tile, lane-dense)
    m_ref              : [U, I]  f32     (precomputed logit table, VMEM-resident)
    out_ref            : [1, TB] f32     (lane-dense probabilities)
    """
    n_user, n_item = m_ref.shape
    tile_b = out_ref.shape[-1]

    user = user_ref[...]      # [1, TB] int32
    item = item_ref[...]      # [1, TB] int32
    m_tbl = m_ref[...]        # [U, I]  f32

    # Stage 1 (item gather): v[u, b] = M[u, item[b]].
    # Exact 0/1-mask accumulate over the 12 item columns (VPU only, f32 exact).
    v = jnp.zeros((n_user, tile_b), jnp.float32)
    for i in range(n_item):
        mi = (item == i).astype(jnp.float32)        # [1, TB] 0/1 mask
        v = v + mi * m_tbl[:, i:i + 1]              # [U, TB]

    # Stage 2 (user select + reduce): z[b] = v[user[b], b].
    row_id = lax.broadcasted_iota(jnp.int32, (n_user, tile_b), 0)   # [U, TB]
    mask_u = (row_id == user).astype(jnp.float32)                   # [U, TB]
    z = jnp.sum(mask_u * v, axis=0, keepdims=True)                  # [1, TB]

    # Single sigmoid per element: sigmoid(z) = 0.5*(1 + tanh(z/2)).
    out_ref[...] = 0.5 * (1.0 + jnp.tanh(0.5 * z))

    # TODO(synk): PyTorch raises ValueError on NaN in theta/a/b; in-kernel
    # exceptions are not expressible, so that check is omitted (NaN propagates).


def _round_up(x, m):
    return pl.cdiv(x, m) * m


def mirt_forward(theta_table, a_table, b_table, user, item, *, max_tile_b=1024):
    """Fused MIRT forward.  user/item: [B] int -> [B] f32 probabilities."""
    n_user, _ = theta_table.shape
    n_item = a_table.shape[0]
    batch = user.shape[0]

    # --- Table-side precompute (pure XLA on 10x32 + 12x32 + 12x1 elements) ---
    # sigmoid(gather(T)) == gather(sigmoid(T)) and the latent-dim dot only
    # depends on the (u, i) pair, so fold everything into M[u, i].
    theta_s = THETA_RANGE * jax.nn.sigmoid(theta_table)              # [U, D]
    a_s = A_RANGE * jax.nn.sigmoid(a_table)                          # [I, D]
    # Exact f32 broadcast-sum (avoids MXU bf16 rounding on this tiny contraction).
    m_tbl = jnp.sum(theta_s[:, None, :] * a_s[None, :, :], axis=-1)  # [U, I]
    m_tbl = m_tbl - b_table[:, 0][None, :]                           # [U, I]

    # Lane tile: multiple of 128 (lane-dense), capped for small batches.
    tile_b = min(max_tile_b, _round_up(batch, 128))
    b_pad = _round_up(batch, tile_b)
    n_tiles = b_pad // tile_b

    # Pad index vectors (padding rows look up (0, 0); results are sliced away).
    # TODO(synk): out-of-range indices are not surfaced as an error (PyTorch
    # embedding would raise); they simply select no table entry here.
    user_p = jnp.zeros((1, b_pad), jnp.int32).at[0, :batch].set(user.astype(jnp.int32))
    item_p = jnp.zeros((1, b_pad), jnp.int32).at[0, :batch].set(item.astype(jnp.int32))

    out = pl.pallas_call(
        _mirt_lookup_kernel,
        out_shape=jax.ShapeDtypeStruct((1, b_pad), jnp.float32),
        grid=(n_tiles,),
        in_specs=[
            pl.BlockSpec((1, tile_b), lambda i: (0, i)),          # user indices (tiled)
            pl.BlockSpec((1, tile_b), lambda i: (0, i)),          # item indices (tiled)
            pl.BlockSpec((n_user, n_item), lambda i: (0, 0)),     # logit table (resident)
        ],
        out_specs=pl.BlockSpec((1, tile_b), lambda i: (0, i)),    # lane-dense output
        compiler_params=pltpu.CompilerParams(
            dimension_semantics=("parallel",)),                   # v7x: shard tiles on both TCs
    )(user_p, item_p, m_tbl)
    return out[0, :batch]


@jax.jit
def mirtnet_apply(params, user, item):
    """MIRTNet.forward(user, item, fairness=False)."""
    # TODO(synk): fairness=True branch and the a_range=None softplus path are
    # not implemented (module is configured with a_range / theta_range set).
    return mirt_forward(params["theta"], params["a"], params["b"], user, item)


def init_params(key):
    k1, k2, k3 = jax.random.split(key, 3)
    # nn.Embedding default init is N(0, 1); use deterministic normal draws.
    return {
        "theta": jax.random.normal(k1, (USER_NUM, LATENT_DIM), jnp.float32),
        "a": jax.random.normal(k2, (ITEM_NUM, LATENT_DIM), jnp.float32),
        "b": jax.random.normal(k3, (ITEM_NUM, 1), jnp.float32),
    }


if __name__ == "__main__":
    key = jax.random.PRNGKey(0)
    kp, ku, ki = jax.random.split(key, 3)
    params = init_params(kp)

    B = 8
    user = jax.random.randint(ku, (B,), 0, USER_NUM, dtype=jnp.int32)
    item = jax.random.randint(ki, (B,), 0, ITEM_NUM, dtype=jnp.int32)

    out = mirtnet_apply(params, user, item)
    out = jax.block_until_ready(out)

    # Pure-JAX reference mirroring the PyTorch forward exactly.
    theta_r = THETA_RANGE * jax.nn.sigmoid(jnp.take(params["theta"], user, axis=0))
    a_r = A_RANGE * jax.nn.sigmoid(jnp.take(params["a"], item, axis=0))
    b_r = jnp.take(params["b"], item, axis=0)[:, 0]
    ref = 1.0 / (1.0 + jnp.exp(-jnp.sum(a_r * theta_r, axis=-1) + b_r))

    assert out.shape == (B,)
    assert jnp.allclose(out, ref, atol=1e-5, rtol=1e-5), (out, ref)

    print("KERNEL_OK")
</pallas_src>

<mosaic_0001>
module attributes {stable_mosaic.version = 11 : i64} {
  func.func @_mirt_lookup_kernel(%arg0: i32, %arg1: memref<1x128xi32, #tpu.memory_space<vmem>>, %arg2: memref<1x128xi32, #tpu.memory_space<vmem>>, %arg3: memref<10x12xf32, #tpu.memory_space<vmem>>, %arg4: memref<1x128xf32, #tpu.memory_space<vmem>>) attributes {dimension_semantics = [#tpu.dimension_semantics<parallel>], iteration_bounds = array<i64: 1>, scalar_prefetch = 0 : i64, scratch_operands = 0 : i64, tpu.core_type = #tpu.core_type<tc>, window_params = [{transform_indices = @transform_0, window_bounds = array<i64: 1, 128>}, {transform_indices = @transform_1, window_bounds = array<i64: 1, 128>}, {pipeline_mode = #tpu.pipeline_mode<synchronous>, transform_indices = @transform_2, window_bounds = array<i64: 10, 12>}, {transform_indices = @transform_3, window_bounds = array<i64: 1, 128>}]} {
    %c0 = arith.constant 0 : index
    %c0_0 = arith.constant 0 : index
    %0 = vector.load %arg1[%c0, %c0_0] : memref<1x128xi32, #tpu.memory_space<vmem>>, vector<1x128xi32>
    %c0_1 = arith.constant 0 : index
    %c0_2 = arith.constant 0 : index
    %1 = vector.load %arg2[%c0_1, %c0_2] : memref<1x128xi32, #tpu.memory_space<vmem>>, vector<1x128xi32>
    %c0_3 = arith.constant 0 : index
    %c0_4 = arith.constant 0 : index
    %2 = vector.load %arg3[%c0_3, %c0_4] : memref<10x12xf32, #tpu.memory_space<vmem>>, vector<10x12xf32>
    %cst = arith.constant 0.000000e+00 : f32
    %3 = vector.broadcast %cst : f32 to vector<10x128xf32>
    %c0_i32 = arith.constant 0 : i32
    %4 = vector.broadcast %c0_i32 : i32 to vector<1x128xi32>
    %5 = arith.cmpi eq, %1, %4 : vector<1x128xi32>
    %6 = arith.extui %5 : vector<1x128xi1> to vector<1x128xi32>
    %7 = arith.sitofp %6 : vector<1x128xi32> to vector<1x128xf32>
    %8 = vector.extract_strided_slice %2 {offsets = [0, 0], sizes = [10, 1], strides = [1, 1]} : vector<10x12xf32> to vector<10x1xf32>
    %9 = vector.broadcast %7 : vector<1x128xf32> to vector<10x128xf32>
    %10 = vector.broadcast %8 : vector<10x1xf32> to vector<10x128xf32>
    %11 = arith.mulf %9, %10 : vector<10x128xf32>
    %12 = arith.addf %3, %11 : vector<10x128xf32>
    %c1_i32 = arith.constant 1 : i32
    %13 = vector.broadcast %c1_i32 : i32 to vector<1x128xi32>
    %14 = arith.cmpi eq, %1, %13 : vector<1x128xi32>
    %15 = arith.extui %14 : vector<1x128xi1> to vector<1x128xi32>
    %16 = arith.sitofp %15 : vector<1x128xi32> to vector<1x128xf32>
    %17 = vector.extract_strided_slice %2 {offsets = [0, 1], sizes = [10, 1], strides = [1, 1]} : vector<10x12xf32> to vector<10x1xf32>
    %18 = vector.broadcast %16 : vector<1x128xf32> to vector<10x128xf32>
    %19 = vector.broadcast %17 : vector<10x1xf32> to vector<10x128xf32>
    %20 = arith.mulf %18, %19 : vector<10x128xf32>
    %21 = arith.addf %12, %20 : vector<10x128xf32>
    %c2_i32 = arith.constant 2 : i32
    %22 = vector.broadcast %c2_i32 : i32 to vector<1x128xi32>
    %23 = arith.cmpi eq, %1, %22 : vector<1x128xi32>
    %24 = arith.extui %23 : vector<1x128xi1> to vector<1x128xi32>
    %25 = arith.sitofp %24 : vector<1x128xi32> to vector<1x128xf32>
    %26 = vector.extract_strided_slice %2 {offsets = [0, 2], sizes = [10, 1], strides = [1, 1]} : vector<10x12xf32> to vector<10x1xf32>
    %27 = vector.broadcast %25 : vector<1x128xf32> to vector<10x128xf32>
    %28 = vector.broadcast %26 : vector<10x1xf32> to vector<10x128xf32>
    %29 = arith.mulf %27, %28 : vector<10x128xf32>
    %30 = arith.addf %21, %29 : vector<10x128xf32>
    %c3_i32 = arith.constant 3 : i32
    %31 = vector.broadcast %c3_i32 : i32 to vector<1x128xi32>
    %32 = arith.cmpi eq, %1, %31 : vector<1x128xi32>
    %33 = arith.extui %32 : vector<1x128xi1> to vector<1x128xi32>
    %34 = arith.sitofp %33 : vector<1x128xi32> to vector<1x128xf32>
    %35 = vector.extract_strided_slice %2 {offsets = [0, 3], sizes = [10, 1], strides = [1, 1]} : vector<10x12xf32> to vector<10x1xf32>
    %36 = vector.broadcast %34 : vector<1x128xf32> to vector<10x128xf32>
    %37 = vector.broadcast %35 : vector<10x1xf32> to vector<10x128xf32>
    %38 = arith.mulf %36, %37 : vector<10x128xf32>
    %39 = arith.addf %30, %38 : vector<10x128xf32>
    %c4_i32 = arith.constant 4 : i32
    %40 = vector.broadcast %c4_i32 : i32 to vector<1x128xi32>
    %41 = arith.cmpi eq, %1, %40 : vector<1x128xi32>
    %42 = arith.extui %41 : vector<1x128xi1> to vector<1x128xi32>
    %43 = arith.sitofp %42 : vector<1x128xi32> to vector<1x128xf32>
    %44 = vector.extract_strided_slice %2 {offsets = [0, 4], sizes = [10, 1], strides = [1, 1]} : vector<10x12xf32> to vector<10x1xf32>
    %45 = vector.broadcast %43 : vector<1x128xf32> to vector<10x128xf32>
    %46 = vector.broadcast %44 : vector<10x1xf32> to vector<10x128xf32>
    %47 = arith.mulf %45, %46 : vector<10x128xf32>
    %48 = arith.addf %39, %47 : vector<10x128xf32>
    %c5_i32 = arith.constant 5 : i32
    %49 = vector.broadcast %c5_i32 : i32 to vector<1x128xi32>
    %50 = arith.cmpi eq, %1, %49 : vector<1x128xi32>
    %51 = arith.extui %50 : vector<1x128xi1> to vector<1x128xi32>
    %52 = arith.sitofp %51 : vector<1x128xi32> to vector<1x128xf32>
    %53 = vector.extract_strided_slice %2 {offsets = [0, 5], sizes = [10, 1], strides = [1, 1]} : vector<10x12xf32> to vector<10x1xf32>
    %54 = vector.broadcast %52 : vector<1x128xf32> to vector<10x128xf32>
    %55 = vector.broadcast %53 : vector<10x1xf32> to vector<10x128xf32>
    %56 = arith.mulf %54, %55 : vector<10x128xf32>
    %57 = arith.addf %48, %56 : vector<10x128xf32>
    %c6_i32 = arith.constant 6 : i32
    %58 = vector.broadcast %c6_i32 : i32 to vector<1x128xi32>
    %59 = arith.cmpi eq, %1, %58 : vector<1x128xi32>
    %60 = arith.extui %59 : vector<1x128xi1> to vector<1x128xi32>
    %61 = arith.sitofp %60 : vector<1x128xi32> to vector<1x128xf32>
    %62 = vector.extract_strided_slice %2 {offsets = [0, 6], sizes = [10, 1], strides = [1, 1]} : vector<10x12xf32> to vector<10x1xf32>
    %63 = vector.broadcast %61 : vector<1x128xf32> to vector<10x128xf32>
    %64 = vector.broadcast %62 : vector<10x1xf32> to vector<10x128xf32>
    %65 = arith.mulf %63, %64 : vector<10x128xf32>
    %66 = arith.addf %57, %65 : vector<10x128xf32>
    %c7_i32 = arith.constant 7 : i32
    %67 = vector.broadcast %c7_i32 : i32 to vector<1x128xi32>
    %68 = arith.cmpi eq, %1, %67 : vector<1x128xi32>
    %69 = arith.extui %68 : vector<1x128xi1> to vector<1x128xi32>
    %70 = arith.sitofp %69 : vector<1x128xi32> to vector<1x128xf32>
    %71 = vector.extract_strided_slice %2 {offsets = [0, 7], sizes = [10, 1], strides = [1, 1]} : vector<10x12xf32> to vector<10x1xf32>
    %72 = vector.broadcast %70 : vector<1x128xf32> to vector<10x128xf32>
    %73 = vector.broadcast %71 : vector<10x1xf32> to vector<10x128xf32>
    %74 = arith.mulf %72, %73 : vector<10x128xf32>
    %75 = arith.addf %66, %74 : vector<10x128xf32>
    %c8_i32 = arith.constant 8 : i32
    %76 = vector.broadcast %c8_i32 : i32 to vector<1x128xi32>
    %77 = arith.cmpi eq, %1, %76 : vector<1x128xi32>
    %78 = arith.extui %77 : vector<1x128xi1> to vector<1x128xi32>
    %79 = arith.sitofp %78 : vector<1x128xi32> to vector<1x128xf32>
    %80 = vector.extract_strided_slice %2 {offsets = [0, 8], sizes = [10, 1], strides = [1, 1]} : vector<10x12xf32> to vector<10x1xf32>
    %81 = vector.broadcast %79 : vector<1x128xf32> to vector<10x128xf32>
    %82 = vector.broadcast %80 : vector<10x1xf32> to vector<10x128xf32>
    %83 = arith.mulf %81, %82 : vector<10x128xf32>
    %84 = arith.addf %75, %83 : vector<10x128xf32>
    %c9_i32 = arith.constant 9 : i32
    %85 = vector.broadcast %c9_i32 : i32 to vector<1x128xi32>
    %86 = arith.cmpi eq, %1, %85 : vector<1x128xi32>
    %87 = arith.extui %86 : vector<1x128xi1> to vector<1x128xi32>
    %88 = arith.sitofp %87 : vector<1x128xi32> to vector<1x128xf32>
    %89 = vector.extract_strided_slice %2 {offsets = [0, 9], sizes = [10, 1], strides = [1, 1]} : vector<10x12xf32> to vector<10x1xf32>
    %90 = vector.broadcast %88 : vector<1x128xf32> to vector<10x128xf32>
    %91 = vector.broadcast %89 : vector<10x1xf32> to vector<10x128xf32>
    %92 = arith.mulf %90, %91 : vector<10x128xf32>
    %93 = arith.addf %84, %92 : vector<10x128xf32>
    %c10_i32 = arith.constant 10 : i32
    %94 = vector.broadcast %c10_i32 : i32 to vector<1x128xi32>
    %95 = arith.cmpi eq, %1, %94 : vector<1x128xi32>
    %96 = arith.extui %95 : vector<1x128xi1> to vector<1x128xi32>
    %97 = arith.sitofp %96 : vector<1x128xi32> to vector<1x128xf32>
    %98 = vector.extract_strided_slice %2 {offsets = [0, 10], sizes = [10, 1], strides = [1, 1]} : vector<10x12xf32> to vector<10x1xf32>
    %99 = vector.broadcast %97 : vector<1x128xf32> to vector<10x128xf32>
    %100 = vector.broadcast %98 : vector<10x1xf32> to vector<10x128xf32>
    %101 = arith.mulf %99, %100 : vector<10x128xf32>
    %102 = arith.addf %93, %101 : vector<10x128xf32>
    %c11_i32 = arith.constant 11 : i32
    %103 = vector.broadcast %c11_i32 : i32 to vector<1x128xi32>
    %104 = arith.cmpi eq, %1, %103 : vector<1x128xi32>
    %105 = arith.extui %104 : vector<1x128xi1> to vector<1x128xi32>
    %106 = arith.sitofp %105 : vector<1x128xi32> to vector<1x128xf32>
    %107 = vector.extract_strided_slice %2 {offsets = [0, 11], sizes = [10, 1], strides = [1, 1]} : vector<10x12xf32> to vector<10x1xf32>
    %108 = vector.broadcast %106 : vector<1x128xf32> to vector<10x128xf32>
    %109 = vector.broadcast %107 : vector<10x1xf32> to vector<10x128xf32>
    %110 = arith.mulf %108, %109 : vector<10x128xf32>
    %111 = arith.addf %102, %110 : vector<10x128xf32>
    %112 = tpu.iota {dimensions = array<i32: 0>} : vector<10x128xi32>
    %113 = vector.broadcast %0 : vector<1x128xi32> to vector<10x128xi32>
    %114 = arith.cmpi eq, %112, %113 : vector<10x128xi32>
    %115 = arith.extui %114 : vector<10x128xi1> to vector<10x128xi32>
    %116 = arith.sitofp %115 : vector<10x128xi32> to vector<10x128xf32>
    %117 = arith.mulf %116, %111 : vector<10x128xf32>
    %cst_5 = arith.constant dense<0.000000e+00> : vector<128xf32>
    %118 = vector.multi_reduction <add>, %117, %cst_5 [0] : vector<10x128xf32> to vector<128xf32>
    %119 = vector.shape_cast %118 : vector<128xf32> to vector<1x128xf32>
    %cst_6 = arith.constant 5.000000e-01 : f32
    %120 = vector.broadcast %cst_6 : f32 to vector<1x128xf32>
    %121 = arith.mulf %120, %119 : vector<1x128xf32>
    %122 = math.tanh %121 : vector<1x128xf32>
    %cst_7 = arith.constant 1.000000e+00 : f32
    %123 = vector.broadcast %cst_7 : f32 to vector<1x128xf32>
    %124 = arith.addf %123, %122 : vector<1x128xf32>
    %cst_8 = arith.constant 5.000000e-01 : f32
    %125 = vector.broadcast %cst_8 : f32 to vector<1x128xf32>
    %126 = arith.mulf %125, %124 : vector<1x128xf32>
    %c0_9 = arith.constant 0 : index
    %c0_10 = arith.constant 0 : index
    %127 = vector.load %arg4[%c0_9, %c0_10] : memref<1x128xf32, #tpu.memory_space<vmem>>, vector<1x128xf32>
    tpu.vector_store %arg4[%c0_9, %c0_10], %126 {strides = array<i32>} : memref<1x128xf32, #tpu.memory_space<vmem>>, vector<1x128xf32>,
    return
  }
  func.func @transform_0(%arg0: i32) -> (i32, i32) {
    %c0_i32 = arith.constant 0 : i32
    %c0_i32_0 = arith.constant 0 : i32
    return %c0_i32, %arg0 : i32, i32
  }
  func.func @transform_1(%arg0: i32) -> (i32, i32) {
    %c0_i32 = arith.constant 0 : i32
    %c0_i32_0 = arith.constant 0 : i32
    return %c0_i32, %arg0 : i32, i32
  }
  func.func @transform_2(%arg0: i32) -> (i32, i32) {
    %c0_i32 = arith.constant 0 : i32
    %c0_i32_0 = arith.constant 0 : i32
    %c0_i32_1 = arith.constant 0 : i32
    return %c0_i32, %c0_i32_0 : i32, i32
  }
  func.func @transform_3(%arg0: i32) -> (i32, i32) {
    %c0_i32 = arith.constant 0 : i32
    %c0_i32_0 = arith.constant 0 : i32
    return %c0_i32, %arg0 : i32, i32
  }
}

</mosaic_0001>

<bundles_post_ra>
// kernel: mirtnet_apply.1
= control target key start
LH: loop header
LB: loop body
LE: loop exit
PB: predicated region body
PF: predicated region fallthrough
CT: control target
= control target key end

     0   :  { %v318_v0 = vmov 1   ;;  %v319_v1 = vmov 0   ;;  %v320_v3 = vmov 2   ;;  %v321_v5 = vmov 3   ;;  %s394_s2 = inlined_call_operand.vmem [shape: f32[10,12], index: 2, kind: input, shape index: {}]   ;;  %s395_s0 = inlined_call_operand.vmem [shape: s32[1,128], index: 0, kind: input, shape index: {}]   ;;  %s396_s1 = inlined_call_operand.vmem [shape: s32[1,128], index: 1, kind: input, shape index: {}]   ;;  %s397_s3 = inlined_call_operand.vmem [shape: f32[1,128], index: 3, kind: output, shape index: {}]  }
   0x1   :  { %294 = vset.pattern.permute.xlu1 %v318_v0  ;;  %293 = vset.pattern.permute.xlu0 %v319_v1  ;;  %v16_v2 = vld [vmem:[%s394_s2] sm:$0xff]  ;;  %v17_v4 = vld [vmem:[%s394_s2 + $0x8] sm:$0x3]  ;;  %v322_v6 = vmov 4   ;;  %v323_v7 = vmov 5   ;;  %v324_v8 = vmov 6  }
   0x2   :  { %45 = vperm.xlu1 %294, %v16_v2   ;;  %26 = vperm.xlu0 %293, %v16_v2   ;;  %v325_v9 = vmov 8   ;;  %v326_v10 = vmov 7   ;;  %v327_v11 = vmov 10   ;;  %v328_v12 = vmov 11   ;;  %v360_v22 = vld [vmem:[%s396_s1] sm:$0x1] }
   0x3   :  { %295 = vset.pattern.permute.xlu2 %v320_v3  ;;  %v329_v13 = vmov 9   ;;  %vm38_vm0 = vcmp.eq.s32.totalorder %v360_v22, 1  ;;  %vm18_vm1 = vcmp.eq.s32.totalorder %v360_v22, 0  ;;  %v330_v25 = vmov 0.0  }
   0x4   :  { %63 = vperm.xlu2 %295, %v16_v2   ;;  %v267_v26 = vsel %vm38_vm0, 1.0, %v330_v25  ;;  %v266_v27 = vsel %vm18_vm1, 1.0, %v330_v25  ;;  %vm56_vm2 = vcmp.eq.s32.totalorder %v360_v22, 2  ;;  %vm74_vm3 = vcmp.eq.s32.totalorder %v360_v22, 3 }
   0x5   :  { %v42_v29 = vperm.slane %v267_v26, 0  ;;  %v22_v30 = vperm.slane %v266_v27, 0  ;;  %v268_v31 = vsel %vm56_vm2, 1.0, %v330_v25  ;;  %v269_v33 = vsel %vm74_vm3, 1.0, %v330_v25 }
   0x6   :  { %v60_v35 = vperm.slane %v268_v31, 0  ;;  %vm92_vm4 = vcmp.eq.s32.totalorder %v360_v22, 4  ;;  %vm110_vm5 = vcmp.eq.s32.totalorder %v360_v22, 5  ;;  %v78_v38 = vperm.slane %v269_v33, 0 }
   0x7   :  { %v270_v39 = vsel %vm92_vm4, 1.0, %v330_v25  ;;  %v271_v45 = vsel %vm110_vm5, 1.0, %v330_v25  ;;  %vm128_vm6 = vcmp.eq.s32.totalorder %v360_v22, 6  ;;  %vm146_vm7 = vcmp.eq.s32.totalorder %v360_v22, 7 }
   0x8   :  { %v96_v46 = vperm.slane %v270_v39, 0  ;;  %v114_v50 = vperm.slane %v271_v45, 0  ;;  %v272_v54 = vsel %vm128_vm6, 1.0, %v330_v25  ;;  %v273_v63 = vsel %vm146_vm7, 1.0, %v330_v25 }
   0x9   :  { %v132_v61 = vperm.slane %v272_v54, 0  ;;  %vm164_vm8 = vcmp.eq.s32.totalorder %v360_v22, 8  ;;  %vm182_vm9 = vcmp.eq.s32.totalorder %v360_v22, 9  ;;  %vm200_vm10 = vcmp.eq.s32.totalorder %v360_v22, 10 }
   0xa   :  { %49 = vperm.xlu1 %294, %v17_v4   ;;  %31 = vperm.xlu0 %293, %v17_v4   ;;  %vm218_vm11 = vcmp.eq.s32.totalorder %v360_v22, 11  ;;  %v236_v26 = vlaneseq  ;;  %vm248_vm14 = vcmask 1041408  }
   0xc   :  { %67 = vperm.xlu2 %295, %v17_v4  }
  0x12   :  { %297 = vset.pattern.permute.xlu1 %v321_v5  ;;  %296 = vset.pattern.permute.xlu0 %v321_v5 }
  0x13   :  { %85 = vperm.xlu1 %297, %v17_v4   ;;  %81 = vperm.xlu0 %296, %v16_v2  }
  0x14   :  { %298 = vset.pattern.permute.xlu2 %v322_v6 }
  0x15   :  { %99 = vperm.xlu2 %298, %v16_v2  }
  0x1b   :  { %299 = vset.pattern.permute.xlu1 %v322_v6  ;;  %301 = vset.pattern.permute.xlu0 %v323_v7 }
  0x1c   :  { %103 = vperm.xlu1 %299, %v17_v4   ;;  %117 = vperm.xlu0 %301, %v16_v2  }
  0x1d   :  { %300 = vset.pattern.permute.xlu2 %v323_v7  ;;  %v274_v7 = vsel %vm164_vm8, 1.0, %v330_v25 }
  0x1e   :  { %121 = vperm.xlu2 %300, %v17_v4  }
  0x24   :  { %302 = vset.pattern.permute.xlu1 %v324_v8  ;;  %306 = vset.pattern.permute.xlu0 %v325_v9 }
  0x25   :  { %139 = vperm.xlu1 %302, %v17_v4   ;;  %175 = vperm.xlu0 %306, %v17_v4  }
  0x26   :  { %303 = vset.pattern.permute.xlu2 %v324_v8 }
  0x27   :  { %135 = vperm.xlu2 %303, %v16_v2  }
  0x2d   :  { %304 = vset.pattern.permute.xlu1 %v326_v10  ;;  %311 = vset.pattern.permute.xlu0 %v327_v11 }
  0x2e   :  { %157 = vperm.xlu1 %304, %v17_v4   ;;  %207 = vperm.xlu0 %311, %v16_v2  }
  0x2f   :  { %305 = vset.pattern.permute.xlu2 %v326_v10 }
  0x30   :  { %153 = vperm.xlu2 %305, %v16_v2  }
  0x36   :  { %307 = vset.pattern.permute.xlu1 %v325_v9  ;;  %314 = vset.pattern.permute.xlu0 %v328_v12 }
  0x37   :  { %171 = vperm.xlu1 %307, %v16_v2  }
  0x38   :  { %308 = vset.pattern.permute.xlu2 %v329_v13 }
  0x39   :  { %193 = vperm.xlu2 %308, %v17_v4  }
  0x3f   :  { %309 = vset.pattern.permute.xlu1 %v329_v13 }
  0x40   :  { %189 = vperm.xlu1 %309, %v16_v2  }
  0x41   :  { %310 = vset.pattern.permute.xlu2 %v327_v11 }
  0x42   :  { %211 = vperm.xlu2 %310, %v17_v4  }
  0x48   :  { %312 = vset.pattern.permute.xlu1 %v328_v12 }
  0x49   :  { %229 = vperm.xlu1 %312, %v17_v4   ;;  %v150_v4 = vperm.slane %v273_v63, 0 }
  0x4a   :  { %313 = vset.pattern.permute.xlu2 %v328_v12  ;;  %v275_v12 = vsel %vm182_vm9, 1.0, %v330_v25 }
  0x4b   :  { %225 = vperm.xlu2 %313, %v16_v2  }
  0x5e   :  { %v64_v14 = vpop.permute.xlu2 %63 }
  0x5f   :  { %v70_v43 = vmul.f32 %v64_v14, %v60_v35  ;;  %v168_v14 = vperm.slane %v274_v7, 0 }
  0x66   :  { %v68_v15 = vpop.permute.xlu2 %67 }
  0x67   :  { %v71_v52 = vmul.f32 %v68_v15, %v60_v35 }
  0x6f   :  { %v100_v18 = vpop.permute.xlu2 %99 }
  0x70   :  { %v106_v56 = vmul.f32 %v100_v18, %v96_v46 }
  0x74   :  { %v46_v16 = vpop.permute.xlu1 %45  ;;  %v27_v19 = vpop.permute.xlu0 %26 }
  0x75   :  { %v52_v36 = vmul.f32 %v46_v16, %v42_v29  ;;  %v34_v37 = vmul.f32 %v27_v19, %v22_v30  ;;  %v186_v19 = vperm.slane %v275_v12, 0 }
  0x77   :  { %v54_v44 = vadd.f32 %v52_v36, %v34_v37  ;;  %v237_v36 = vshrl.u32 %v236_v26, 7 }
  0x78   :  { %v122_v21 = vpop.permute.xlu2 %121 }
  0x79   :  { %v72_v51 = vadd.f32 %v70_v43, %v54_v44  ;;  %v125_v2 = vmul.f32 %v122_v21, %v114_v50 }
  0x7c   :  { %v50_v17 = vpop.permute.xlu1 %49  ;;  %v32_v23 = vpop.permute.xlu0 %31 }
  0x7d   :  { %v53_v40 = vmul.f32 %v50_v17, %v42_v29  ;;  %v35_v41 = vmul.f32 %v32_v23, %v22_v30  ;;  %v277_v30 = vsel %vm218_vm11, 1.0, %v330_v25 }
  0x7e   :  { %v222_v39 = vperm.slane %v277_v30, 0 }
  0x7f   :  { %v55_v48 = vadd.f32 %v53_v40, %v35_v41  ;;  %v238_v40 = vadd.s32 8, %v237_v36  ;;  %v315_v41 = vld [vmem:[%s395_s0] ss:$0 sm:$0xff] }
  0x80   :  { %vm240_vm13 = vcmp.eq.s32.totalorder %v237_v36, %v315_v41 }
  0x81   :  { %v136_v28 = vpop.permute.xlu2 %135  ;;  %v73_v58 = vadd.f32 %v71_v52, %v55_v48  ;;  %vm241_vm12 = vcmp.eq.s32.totalorder %v238_v40, %v315_v41 }
  0x82   :  { %v142_v5 = vmul.f32 %v136_v28, %v132_v61 }
  0x85   :  { %v86_v20 = vpop.permute.xlu1 %85  ;;  %v82_v34 = vpop.permute.xlu0 %81 }
  0x86   :  { %v88_v47 = vmul.f32 %v82_v34, %v78_v38  ;;  %v89_v53 = vmul.f32 %v86_v20, %v78_v38 }
  0x88   :  { %v90_v57 = vadd.f32 %v88_v47, %v72_v51  ;;  %v91_v0 = vadd.f32 %v89_v53, %v73_v58  ;;  %v278_v51 = vsel %vm240_vm13, 1.0, %v330_v25 }
  0x8a   :  { %v154_v42 = vpop.permute.xlu2 %153  ;;  %v108_v1 = vadd.f32 %v106_v56, %v90_v57 }
  0x8b   :  { %v160_v16 = vmul.f32 %v154_v42, %v150_v4 }
  0x8e   :  { %v104_v24 = vpop.permute.xlu1 %103  ;;  %v118_v55 = vpop.permute.xlu0 %117 }
  0x8f   :  { %v107_v59 = vmul.f32 %v104_v24, %v96_v46  ;;  %v124_v62 = vmul.f32 %v118_v55, %v114_v50  ;;  %v276_v24 = vsel %vm200_vm10, 1.0, %v330_v25  ;;  %v279_v50 = vsel %vm241_vm12, 1.0, %v330_v25 }
  0x90   :  { %v204_v31 = vperm.slane %v276_v24, 0 }
  0x91   :  { %v109_v3 = vadd.f32 %v107_v59, %v91_v0  ;;  %v126_v6 = vadd.f32 %v124_v62, %v108_v1 }
  0x93   :  { %v194_v60 = vpop.permute.xlu2 %193  ;;  %v127_v11 = vadd.f32 %v125_v2, %v109_v3  ;;  %v144_v15 = vadd.f32 %v142_v5, %v126_v6 }
  0x94   :  { %v197_v34 = vmul.f32 %v194_v60, %v186_v19 }
  0x95   :  { %v162_v27 = vadd.f32 %v160_v16, %v144_v15 }
  0x97   :  { %v140_v32 = vpop.permute.xlu1 %139  ;;  %v176_v10 = vpop.permute.xlu0 %175 }
  0x98   :  { %v143_v9 = vmul.f32 %v140_v32, %v132_v61  ;;  %v179_v23 = vmul.f32 %v176_v10, %v168_v14 }
  0x9a   :  { %v145_v17 = vadd.f32 %v143_v9, %v127_v11 }
  0x9c   :  { %v212_v18 = vpop.permute.xlu2 %211 }
  0x9d   :  { %v215_v43 = vmul.f32 %v212_v18, %v204_v31 }
  0xa0   :  { %v158_v49 = vpop.permute.xlu1 %157  ;;  %v208_v29 = vpop.permute.xlu0 %207 }
  0xa1   :  { %v161_v13 = vmul.f32 %v158_v49, %v150_v4  ;;  %v214_v38 = vmul.f32 %v208_v29, %v204_v31 }
  0xa3   :  { %v163_v21 = vadd.f32 %v161_v13, %v145_v17 }
  0xa5   :  { %v181_v35 = vadd.f32 %v179_v23, %v163_v21  ;;  %v226_v22 = vpop.permute.xlu2 %225 }
  0xa6   :  { %v232_v45 = vmul.f32 %v226_v22, %v222_v39 }
  0xa7   :  { %v199_v42 = vadd.f32 %v197_v34, %v181_v35 }
  0xa9   :  { %v172_v8 = vpop.permute.xlu1 %171  ;;  %v217_v47 = vadd.f32 %v215_v43, %v199_v42 }
  0xaa   :  { %v178_v20 = vmul.f32 %v172_v8, %v168_v14 }
  0xac   :  { %v180_v32 = vadd.f32 %v178_v20, %v162_v27 }
  0xb2   :  { %v190_v28 = vpop.permute.xlu1 %189 }
  0xb3   :  { %v196_v33 = vmul.f32 %v190_v28, %v186_v19 }
  0xb5   :  { %v198_v37 = vadd.f32 %v196_v33, %v180_v32 }
  0xb7   :  { %v216_v44 = vadd.f32 %v214_v38, %v198_v37 }
  0xb9   :  { %v234_v49 = vadd.f32 %v232_v45, %v216_v44 }
  0xbb   :  { %v230_v46 = vpop.permute.xlu1 %229  ;;  %v246_v54 = vmul.f32 %v278_v51, %v234_v49 }
  0xbc   :  { %v233_v48 = vmul.f32 %v230_v46, %v222_v39 }
  0xbe   :  { %v235_v52 = vadd.f32 %v233_v48, %v217_v47 }
  0xc0   :  { %v247_v53 = vmul.f32 %v279_v50, %v235_v52 }
  0xc2   :  { %v249_v55 = vsel %vm248_vm14, %v247_v53, 0.0 }
  0xc3   :  { %v250_v56 = vadd.f32 %v249_v55, %v246_v54 }
  0xc5   :  { %v251_v57 = vrot.slane %v250_v56, 4 }
  0xc7   :  { %v252_v58 = vadd.f32 %v251_v57, %v250_v56 }
  0xc9   :  { %v253_v59 = vrot.slane %v252_v58, 2 }
  0xcb   :  { %v254_v60 = vadd.f32 %v253_v59, %v252_v58 }
  0xcd   :  { %v255_v61 = vrot.slane %v254_v60, 1 }
  0xcf   :  { %v256_v62 = vadd.f32 %v255_v61, %v254_v60 }
  0xd1   :  { %v257_v63 = vmul.f32 0.5, %v256_v62 }
  0xd3   :  { %316 = vtanh.f32 %v257_v63 }
  0xd9   :  { %v317_v0 = vpop.eup %316 }
  0xda   :  { %v259_v1 = vadd.f32 1.0, %v317_v0 }
  0xdc   :  { %v260_v2 = vmul.f32 0.5, %v259_v1 }
  0xde   :  { %261 = vst [vmem:[%s397_s3] sm:$0x1] %v260_v2 }

</bundles_post_ra>
